<compile_context>
chip_gen: v7x
topology: tpu7x:2x2x1
jax: 0.10.0
libtpu: 0.0.40
codegen_flags: <defaults>
</compile_context>

<pallas_src>
import functools
import math

import jax
import jax.numpy as jnp
from jax.experimental import pallas as pl
from jax.experimental.pallas import tpu as pltpu

LN_EPS = 1e-5  # torch.nn.LayerNorm default eps


# ----------------------------- in-kernel math -----------------------------

def _layernorm(x, gamma, beta):
    mu = jnp.mean(x, axis=-1, keepdims=True)
    xc = x - mu
    var = jnp.mean(xc * xc, axis=-1, keepdims=True)      # biased variance (torch LN)
    inv = jax.lax.rsqrt(var + LN_EPS)
    return xc * inv * gamma + beta


def _erf(x):
    # Abramowitz & Stegun 7.1.26 rational approximation, |err| < 1.5e-7.
    a1, a2, a3, a4, a5 = (0.254829592, -0.284496736, 1.421413741,
                          -1.453152027, 1.061405429)
    p = 0.3275911
    s = jnp.where(x >= 0.0, 1.0, -1.0)
    z = jnp.abs(x)
    t = 1.0 / (1.0 + p * z)
    poly = ((((a5 * t + a4) * t + a3) * t + a2) * t + a1) * t
    return s * (1.0 - poly * jnp.exp(-z * z))


def _gelu(x):
    # Exact (erf-form) GELU, matching torch.nn.GELU() default.
    return 0.5 * x * (1.0 + _erf(x * (1.0 / math.sqrt(2.0))))


def _softmax_last(x):
    m = jnp.max(x, axis=-1, keepdims=True)
    e = jnp.exp(x - m)
    denom = jnp.sum(e, axis=-1, keepdims=True)
    return e * pl.reciprocal(denom, approx=True)   # EUP reciprocal, err ~2^-12


# ------------------------------- the kernel -------------------------------

def vit_block_kernel(num_heads,
                     x_ref,
                     ln1_g_ref, ln1_b_ref,
                     wq_ref, wk_ref, wv_ref, wproj_ref, bproj_ref,
                     ln2_g_ref, ln2_b_ref, w1_ref, b1_ref, w2_ref, b2_ref,
                     o_ref):
    f32 = jnp.float32
    bf16 = jnp.bfloat16

    x = x_ref[...]                                   # (N, E) f32
    n, e = x.shape
    h = num_heads

    # ---- attention branch: LN -> batched per-head QKV -> softmax attn -> proj ----
    xn = _layernorm(x, ln1_g_ref[...], ln1_b_ref[...])
    xn_b = xn.astype(bf16)
    xh = jnp.broadcast_to(xn_b[None, :, :], (h, n, e))          # (H, N, E) bf16

    # Weights are pre-split per head in the wrapper: (H, E, D) / (H, D, E),
    # attention scaling already folded into wq. bf16 x bf16 -> f32 on the MXU.
    q = jnp.einsum('hne,hed->hnd', xh, wq_ref[...], preferred_element_type=f32)
    k = jnp.einsum('hne,hed->hnd', xh, wk_ref[...], preferred_element_type=f32)
    v = jnp.einsum('hne,hed->hnd', xh, wv_ref[...], preferred_element_type=f32)

    energy = jnp.einsum('hnd,hmd->hnm', q.astype(bf16), k.astype(bf16),
                        preferred_element_type=f32)             # (H, N, N)
    att = _softmax_last(energy)                                  # attn dropout = identity
    out = jnp.einsum('hnm,hmd->hnd', att.astype(bf16), v.astype(bf16),
                     preferred_element_type=f32)                 # (H, N, D)

    # Per-head projection partials, then accumulate over heads (equivalent to
    # concat('b h n d -> b n (h d)') followed by the (E,E) projection).
    ph = jnp.einsum('hnd,hde->hne', out.astype(bf16), wproj_ref[...],
                    preferred_element_type=f32)                  # (H, N, E)
    attn = ph[0]
    for i in range(1, h):                                        # cheap leading-dim adds
        attn = attn + ph[i]
    attn = attn + bproj_ref[...]
    x1 = x + attn                                                # residual add (f32)

    # ---- MLP branch: LN -> Linear -> GELU -> Linear ----
    xn2 = _layernorm(x1, ln2_g_ref[...], ln2_b_ref[...])
    hdn = jnp.dot(xn2.astype(bf16), w1_ref[...],
                  preferred_element_type=f32) + b1_ref[...]
    hdn = _gelu(hdn)                                             # f32 GELU
    mlp = jnp.dot(hdn.astype(bf16), w2_ref[...],
                  preferred_element_type=f32) + b2_ref[...]
    o_ref[...] = (x1 + mlp).astype(o_ref.dtype)                  # residual add


# -------------------------------- wrapper ---------------------------------

def _prepare_params(params, num_heads):
    """Split qkv/proj weights per head, fold attention scaling into wq, cast
    matmul weights to bf16 (LN params & biases stay f32)."""
    E = params["wqkv"].shape[0]
    H = num_heads
    D = E // H
    scaling = float(D) ** -0.5
    bf16 = jnp.bfloat16

    # qkv columns are ordered (qkv, head, head_dim) — matches
    # rearrange('b n (qkv h d) -> qkv b h n d').
    wqkv = params["wqkv"].reshape(E, 3, H, D)
    wq = (jnp.transpose(wqkv[:, 0], (1, 0, 2)) * scaling).astype(bf16)  # (H, E, D)
    wk = jnp.transpose(wqkv[:, 1], (1, 0, 2)).astype(bf16)              # (H, E, D)
    wv = jnp.transpose(wqkv[:, 2], (1, 0, 2)).astype(bf16)              # (H, E, D)
    wproj = params["wproj"].reshape(H, D, E).astype(bf16)               # (H, D, E)

    return [
        params["ln1_g"], params["ln1_b"],
        wq, wk, wv, wproj, params["bproj"],
        params["ln2_g"], params["ln2_b"],
        params["w1"].astype(bf16), params["b1"],
        params["w2"].astype(bf16), params["b2"],
    ]


def vit_block(x, params, num_heads):
    B, N, E = x.shape
    H = num_heads
    Hd = params["w1"].shape[1]
    plist = _prepare_params(params, num_heads)

    def full_spec(p):
        nd = p.ndim
        return pl.BlockSpec(p.shape, lambda b, _nd=nd: (0,) * _nd)

    in_specs = ([pl.BlockSpec((None, N, E), lambda b: (b, 0, 0))]
                + [full_spec(p) for p in plist])
    out_spec = pl.BlockSpec((None, N, E), lambda b: (b, 0, 0))

    flops = 2 * B * N * (12 * E * E + 2 * N * E)
    transcendentals = B * (H * N * N + N * Hd)          # softmax exp + GELU exp
    bytes_accessed = (2 * B * N * E * 4
                      + sum(int(p.size) * p.dtype.itemsize for p in plist))

    return pl.pallas_call(
        functools.partial(vit_block_kernel, num_heads),
        out_shape=jax.ShapeDtypeStruct((B, N, E), x.dtype),
        grid=(B,),
        in_specs=in_specs,
        out_specs=out_spec,
        compiler_params=pltpu.CompilerParams(dimension_semantics=("parallel",)),
        cost_estimate=pl.CostEstimate(flops=flops,
                                      transcendentals=transcendentals,
                                      bytes_accessed=bytes_accessed),
    )(x, *plist)


# ------------------------- parameter init + check -------------------------

def init_params(key, embed_dim, expansion):
    E, Hd = embed_dim, expansion * embed_dim
    ks = jax.random.split(key, 6)
    s = 0.02
    return {
        "ln1_g": jnp.ones((1, E), jnp.float32),
        "ln1_b": jnp.zeros((1, E), jnp.float32),
        "wqkv": s * jax.random.normal(ks[0], (E, 3 * E), jnp.float32),   # qkv_bias=False
        "wproj": s * jax.random.normal(ks[1], (E, E), jnp.float32),
        "bproj": s * jax.random.normal(ks[2], (1, E), jnp.float32),
        "ln2_g": jnp.ones((1, E), jnp.float32),
        "ln2_b": jnp.zeros((1, E), jnp.float32),
        "w1": s * jax.random.normal(ks[3], (E, Hd), jnp.float32),
        "b1": s * jax.random.normal(ks[4], (1, Hd), jnp.float32),
        "w2": s * jax.random.normal(ks[5], (Hd, E), jnp.float32),
        "b2": jnp.zeros((1, E), jnp.float32),
    }


def vit_block_reference(x, params, num_heads):
    """Pure-JAX f32 reference mirroring the PyTorch forward (eval mode)."""
    def ln(v, g, b):
        mu = jnp.mean(v, -1, keepdims=True)
        var = jnp.mean((v - mu) ** 2, -1, keepdims=True)
        return (v - mu) * jax.lax.rsqrt(var + LN_EPS) * g + b

    B, N, E = x.shape
    D = E // num_heads
    xn = ln(x, params["ln1_g"][0], params["ln1_b"][0])
    qkv = xn @ params["wqkv"]                                   # (B, N, 3E)
    qkv = qkv.reshape(B, N, 3, num_heads, D).transpose(2, 0, 3, 1, 4)
    q, k, v = qkv[0], qkv[1], qkv[2]                            # (B, H, N, D)
    energy = jnp.einsum("bhij,bhkj->bhik", q, k) * (D ** -0.5)
    att = jax.nn.softmax(energy, axis=-1)
    out = jnp.einsum("bhij,bhjk->bhik", att, v)
    out = out.transpose(0, 2, 1, 3).reshape(B, N, E)
    x1 = x + (out @ params["wproj"] + params["bproj"][0])
    xn2 = ln(x1, params["ln2_g"][0], params["ln2_b"][0])
    h = jax.nn.gelu(xn2 @ params["w1"] + params["b1"][0], approximate=False)
    return x1 + (h @ params["w2"] + params["b2"][0])


if __name__ == "__main__":
    B, N, E = 2, 8, 32          # batch, tokens, embed_dim
    num_heads = 4
    expansion = 4

    key = jax.random.PRNGKey(0)
    kx, kp = jax.random.split(key)
    x = jax.random.normal(kx, (B, N, E), jnp.float32)
    params = init_params(kp, E, expansion)

    out = vit_block(x, params, num_heads)
    out = jax.block_until_ready(out)

    ref = vit_block_reference(x, params, num_heads)
    assert out.shape == (B, N, E)
    # bf16 matmul operands (f32 accumulation) vs f32 reference -> small tolerance.
    assert jnp.allclose(out, ref, atol=5e-3, rtol=5e-3), "mismatch vs reference"

    print("KERNEL_OK")
</pallas_src>

<mosaic_0001>
module attributes {stable_mosaic.version = 11 : i64} {
  func.func @vit_block_kernel(%arg0: i32, %arg1: memref<1x8x32xf32, #tpu.memory_space<vmem>>, %arg2: memref<1x32xf32, #tpu.memory_space<vmem>>, %arg3: memref<1x32xf32, #tpu.memory_space<vmem>>, %arg4: memref<4x32x8xbf16, #tpu.memory_space<vmem>>, %arg5: memref<4x32x8xbf16, #tpu.memory_space<vmem>>, %arg6: memref<4x32x8xbf16, #tpu.memory_space<vmem>>, %arg7: memref<4x8x32xbf16, #tpu.memory_space<vmem>>, %arg8: memref<1x32xf32, #tpu.memory_space<vmem>>, %arg9: memref<1x32xf32, #tpu.memory_space<vmem>>, %arg10: memref<1x32xf32, #tpu.memory_space<vmem>>, %arg11: memref<32x128xbf16, #tpu.memory_space<vmem>>, %arg12: memref<1x128xf32, #tpu.memory_space<vmem>>, %arg13: memref<128x32xbf16, #tpu.memory_space<vmem>>, %arg14: memref<1x32xf32, #tpu.memory_space<vmem>>, %arg15: memref<1x8x32xf32, #tpu.memory_space<vmem>>) attributes {dimension_semantics = [#tpu.dimension_semantics<parallel>], iteration_bounds = array<i64: 2>, scalar_prefetch = 0 : i64, scratch_operands = 0 : i64, tpu.core_type = #tpu.core_type<tc>, window_params = [{transform_indices = @transform_0, window_bounds = array<i64: 1, 8, 32>}, {pipeline_mode = #tpu.pipeline_mode<synchronous>, transform_indices = @transform_1, window_bounds = array<i64: 1, 32>}, {pipeline_mode = #tpu.pipeline_mode<synchronous>, transform_indices = @transform_2, window_bounds = array<i64: 1, 32>}, {pipeline_mode = #tpu.pipeline_mode<synchronous>, transform_indices = @transform_3, window_bounds = array<i64: 4, 32, 8>}, {pipeline_mode = #tpu.pipeline_mode<synchronous>, transform_indices = @transform_4, window_bounds = array<i64: 4, 32, 8>}, {pipeline_mode = #tpu.pipeline_mode<synchronous>, transform_indices = @transform_5, window_bounds = array<i64: 4, 32, 8>}, {pipeline_mode = #tpu.pipeline_mode<synchronous>, transform_indices = @transform_6, window_bounds = array<i64: 4, 8, 32>}, {pipeline_mode = #tpu.pipeline_mode<synchronous>, transform_indices = @transform_7, window_bounds = array<i64: 1, 32>}, {pipeline_mode = #tpu.pipeline_mode<synchronous>, transform_indices = @transform_8, window_bounds = array<i64: 1, 32>}, {pipeline_mode = #tpu.pipeline_mode<synchronous>, transform_indices = @transform_9, window_bounds = array<i64: 1, 32>}, {pipeline_mode = #tpu.pipeline_mode<synchronous>, transform_indices = @transform_10, window_bounds = array<i64: 32, 128>}, {pipeline_mode = #tpu.pipeline_mode<synchronous>, transform_indices = @transform_11, window_bounds = array<i64: 1, 128>}, {pipeline_mode = #tpu.pipeline_mode<synchronous>, transform_indices = @transform_12, window_bounds = array<i64: 128, 32>}, {pipeline_mode = #tpu.pipeline_mode<synchronous>, transform_indices = @transform_13, window_bounds = array<i64: 1, 32>}, {transform_indices = @transform_14, window_bounds = array<i64: 1, 8, 32>}]} {
    %c0 = arith.constant 0 : index
    %c0_0 = arith.constant 0 : index
    %c0_1 = arith.constant 0 : index
    %0 = vector.load %arg1[%c0, %c0_0, %c0_1] : memref<1x8x32xf32, #tpu.memory_space<vmem>>, vector<1x8x32xf32>
    %1 = vector.shape_cast %0 : vector<1x8x32xf32> to vector<8x32xf32>
    %c0_2 = arith.constant 0 : index
    %c0_3 = arith.constant 0 : index
    %2 = vector.load %arg2[%c0_2, %c0_3] : memref<1x32xf32, #tpu.memory_space<vmem>>, vector<1x32xf32>
    %c0_4 = arith.constant 0 : index
    %c0_5 = arith.constant 0 : index
    %3 = vector.load %arg3[%c0_4, %c0_5] : memref<1x32xf32, #tpu.memory_space<vmem>>, vector<1x32xf32>
    %cst = arith.constant dense<0.000000e+00> : vector<8xf32>
    %4 = vector.multi_reduction <add>, %1, %cst [1] : vector<8x32xf32> to vector<8xf32>
    %5 = vector.shape_cast %4 : vector<8xf32> to vector<8x1xf32>
    %cst_6 = arith.constant 3.200000e+01 : f32
    %6 = vector.broadcast %cst_6 : f32 to vector<8x1xf32>
    %7 = arith.divf %5, %6 : vector<8x1xf32>
    %8 = vector.broadcast %7 : vector<8x1xf32> to vector<8x32xf32>
    %9 = arith.subf %1, %8 : vector<8x32xf32>
    %10 = arith.mulf %9, %9 : vector<8x32xf32>
    %cst_7 = arith.constant dense<0.000000e+00> : vector<8xf32>
    %11 = vector.multi_reduction <add>, %10, %cst_7 [1] : vector<8x32xf32> to vector<8xf32>
    %12 = vector.shape_cast %11 : vector<8xf32> to vector<8x1xf32>
    %cst_8 = arith.constant 3.200000e+01 : f32
    %13 = vector.broadcast %cst_8 : f32 to vector<8x1xf32>
    %14 = arith.divf %12, %13 : vector<8x1xf32>
    %cst_9 = arith.constant 9.99999974E-6 : f32
    %15 = vector.broadcast %cst_9 : f32 to vector<8x1xf32>
    %16 = arith.addf %14, %15 : vector<8x1xf32>
    %17 = math.rsqrt %16 : vector<8x1xf32>
    %18 = vector.broadcast %17 : vector<8x1xf32> to vector<8x32xf32>
    %19 = arith.mulf %9, %18 : vector<8x32xf32>
    %20 = vector.broadcast %2 : vector<1x32xf32> to vector<8x32xf32>
    %21 = arith.mulf %19, %20 : vector<8x32xf32>
    %22 = vector.broadcast %3 : vector<1x32xf32> to vector<8x32xf32>
    %23 = arith.addf %21, %22 : vector<8x32xf32>
    %24 = arith.truncf %23 : vector<8x32xf32> to vector<8x32xbf16>
    %25 = vector.shape_cast %24 : vector<8x32xbf16> to vector<1x8x32xbf16>
    %26 = vector.shape_cast %25 : vector<1x8x32xbf16> to vector<1x8x32xbf16>
    %27 = vector.broadcast %26 : vector<1x8x32xbf16> to vector<4x8x32xbf16>
    %c0_10 = arith.constant 0 : index
    %c0_11 = arith.constant 0 : index
    %c0_12 = arith.constant 0 : index
    %28 = vector.load %arg4[%c0_10, %c0_11, %c0_12] : memref<4x32x8xbf16, #tpu.memory_space<vmem>>, vector<4x32x8xbf16>
    "tpu.trace_start"() <{level = 10 : i32, message = "hne,hed->hnd"}> : () -> ()
    %cst_13 = arith.constant dense<0.000000e+00> : vector<4x8x8xf32>
    %29 = tpu.matmul %27, %28, %cst_13 {dimension_numbers = #tpu.dot_dimension_numbers<[2], [1], [1], [2], [0, 0, 0, 1, 1, 2], [0], [0]>} : vector<4x8x32xbf16>, vector<4x32x8xbf16>, vector<4x8x8xf32> -> vector<4x8x8xf32>
    "tpu.trace_stop"() : () -> ()
    %c0_14 = arith.constant 0 : index
    %c0_15 = arith.constant 0 : index
    %c0_16 = arith.constant 0 : index
    %30 = vector.load %arg5[%c0_14, %c0_15, %c0_16] : memref<4x32x8xbf16, #tpu.memory_space<vmem>>, vector<4x32x8xbf16>
    "tpu.trace_start"() <{level = 10 : i32, message = "hne,hed->hnd"}> : () -> ()
    %cst_17 = arith.constant dense<0.000000e+00> : vector<4x8x8xf32>
    %31 = tpu.matmul %27, %30, %cst_17 {dimension_numbers = #tpu.dot_dimension_numbers<[2], [1], [1], [2], [0, 0, 0, 1, 1, 2], [0], [0]>} : vector<4x8x32xbf16>, vector<4x32x8xbf16>, vector<4x8x8xf32> -> vector<4x8x8xf32>
    "tpu.trace_stop"() : () -> ()
    %c0_18 = arith.constant 0 : index
    %c0_19 = arith.constant 0 : index
    %c0_20 = arith.constant 0 : index
    %32 = vector.load %arg6[%c0_18, %c0_19, %c0_20] : memref<4x32x8xbf16, #tpu.memory_space<vmem>>, vector<4x32x8xbf16>
    "tpu.trace_start"() <{level = 10 : i32, message = "hne,hed->hnd"}> : () -> ()
    %cst_21 = arith.constant dense<0.000000e+00> : vector<4x8x8xf32>
    %33 = tpu.matmul %27, %32, %cst_21 {dimension_numbers = #tpu.dot_dimension_numbers<[2], [1], [1], [2], [0, 0, 0, 1, 1, 2], [0], [0]>} : vector<4x8x32xbf16>, vector<4x32x8xbf16>, vector<4x8x8xf32> -> vector<4x8x8xf32>
    "tpu.trace_stop"() : () -> ()
    %34 = arith.truncf %29 : vector<4x8x8xf32> to vector<4x8x8xbf16>
    %35 = arith.truncf %31 : vector<4x8x8xf32> to vector<4x8x8xbf16>
    "tpu.trace_start"() <{level = 10 : i32, message = "hnd,hmd->hnm"}> : () -> ()
    %cst_22 = arith.constant dense<0.000000e+00> : vector<4x8x8xf32>
    %36 = tpu.matmul %34, %35, %cst_22 {dimension_numbers = #tpu.dot_dimension_numbers<[2], [2], [1], [1], [0, 0, 0, 1, 1, 1], [0], [0]>} : vector<4x8x8xbf16>, vector<4x8x8xbf16>, vector<4x8x8xf32> -> vector<4x8x8xf32>
    "tpu.trace_stop"() : () -> ()
    %cst_23 = arith.constant dense<0xFF800000> : vector<4x8xf32>
    %37 = vector.multi_reduction <maximumf>, %36, %cst_23 [2] : vector<4x8x8xf32> to vector<4x8xf32>
    %38 = vector.shape_cast %37 : vector<4x8xf32> to vector<4x8x1xf32>
    %39 = vector.broadcast %38 : vector<4x8x1xf32> to vector<4x8x8xf32>
    %40 = arith.subf %36, %39 : vector<4x8x8xf32>
    %41 = math.exp %40 : vector<4x8x8xf32>
    %cst_24 = arith.constant dense<0.000000e+00> : vector<4x8xf32>
    %42 = vector.multi_reduction <add>, %41, %cst_24 [2] : vector<4x8x8xf32> to vector<4x8xf32>
    %43 = vector.shape_cast %42 : vector<4x8xf32> to vector<4x8x1xf32>
    %44 = tpu.reciprocal %43 {approx = true} : vector<4x8x1xf32> -> vector<4x8x1xf32>
    %45 = vector.broadcast %44 : vector<4x8x1xf32> to vector<4x8x8xf32>
    %46 = arith.mulf %41, %45 : vector<4x8x8xf32>
    %47 = arith.truncf %46 : vector<4x8x8xf32> to vector<4x8x8xbf16>
    %48 = arith.truncf %33 : vector<4x8x8xf32> to vector<4x8x8xbf16>
    "tpu.trace_start"() <{level = 10 : i32, message = "hnm,hmd->hnd"}> : () -> ()
    %cst_25 = arith.constant dense<0.000000e+00> : vector<4x8x8xf32>
    %49 = tpu.matmul %47, %48, %cst_25 {dimension_numbers = #tpu.dot_dimension_numbers<[2], [1], [1], [2], [0, 0, 0, 1, 1, 2], [0], [0]>} : vector<4x8x8xbf16>, vector<4x8x8xbf16>, vector<4x8x8xf32> -> vector<4x8x8xf32>
    "tpu.trace_stop"() : () -> ()
    %50 = arith.truncf %49 : vector<4x8x8xf32> to vector<4x8x8xbf16>
    %c0_26 = arith.constant 0 : index
    %c0_27 = arith.constant 0 : index
    %c0_28 = arith.constant 0 : index
    %51 = vector.load %arg7[%c0_26, %c0_27, %c0_28] : memref<4x8x32xbf16, #tpu.memory_space<vmem>>, vector<4x8x32xbf16>
    "tpu.trace_start"() <{level = 10 : i32, message = "hnd,hde->hne"}> : () -> ()
    %cst_29 = arith.constant dense<0.000000e+00> : vector<4x8x32xf32>
    %52 = tpu.matmul %50, %51, %cst_29 {dimension_numbers = #tpu.dot_dimension_numbers<[2], [1], [1], [2], [0, 0, 0, 1, 1, 2], [0], [0]>} : vector<4x8x8xbf16>, vector<4x8x32xbf16>, vector<4x8x32xf32> -> vector<4x8x32xf32>
    "tpu.trace_stop"() : () -> ()
    %53 = vector.extract_strided_slice %52 {offsets = [0, 0, 0], sizes = [1, 8, 32], strides = [1, 1, 1]} : vector<4x8x32xf32> to vector<1x8x32xf32>
    %54 = vector.shape_cast %53 : vector<1x8x32xf32> to vector<8x32xf32>
    %55 = vector.extract_strided_slice %52 {offsets = [1, 0, 0], sizes = [1, 8, 32], strides = [1, 1, 1]} : vector<4x8x32xf32> to vector<1x8x32xf32>
    %56 = vector.shape_cast %55 : vector<1x8x32xf32> to vector<8x32xf32>
    %57 = arith.addf %54, %56 : vector<8x32xf32>
    %58 = vector.extract_strided_slice %52 {offsets = [2, 0, 0], sizes = [1, 8, 32], strides = [1, 1, 1]} : vector<4x8x32xf32> to vector<1x8x32xf32>
    %59 = vector.shape_cast %58 : vector<1x8x32xf32> to vector<8x32xf32>
    %60 = arith.addf %57, %59 : vector<8x32xf32>
    %61 = vector.extract_strided_slice %52 {offsets = [3, 0, 0], sizes = [1, 8, 32], strides = [1, 1, 1]} : vector<4x8x32xf32> to vector<1x8x32xf32>
    %62 = vector.shape_cast %61 : vector<1x8x32xf32> to vector<8x32xf32>
    %63 = arith.addf %60, %62 : vector<8x32xf32>
    %c0_30 = arith.constant 0 : index
    %c0_31 = arith.constant 0 : index
    %64 = vector.load %arg8[%c0_30, %c0_31] : memref<1x32xf32, #tpu.memory_space<vmem>>, vector<1x32xf32>
    %65 = vector.broadcast %64 : vector<1x32xf32> to vector<8x32xf32>
    %66 = arith.addf %63, %65 : vector<8x32xf32>
    %67 = arith.addf %1, %66 : vector<8x32xf32>
    %c0_32 = arith.constant 0 : index
    %c0_33 = arith.constant 0 : index
    %68 = vector.load %arg9[%c0_32, %c0_33] : memref<1x32xf32, #tpu.memory_space<vmem>>, vector<1x32xf32>
    %c0_34 = arith.constant 0 : index
    %c0_35 = arith.constant 0 : index
    %69 = vector.load %arg10[%c0_34, %c0_35] : memref<1x32xf32, #tpu.memory_space<vmem>>, vector<1x32xf32>
    %cst_36 = arith.constant dense<0.000000e+00> : vector<8xf32>
    %70 = vector.multi_reduction <add>, %67, %cst_36 [1] : vector<8x32xf32> to vector<8xf32>
    %71 = vector.shape_cast %70 : vector<8xf32> to vector<8x1xf32>
    %cst_37 = arith.constant 3.200000e+01 : f32
    %72 = vector.broadcast %cst_37 : f32 to vector<8x1xf32>
    %73 = arith.divf %71, %72 : vector<8x1xf32>
    %74 = vector.broadcast %73 : vector<8x1xf32> to vector<8x32xf32>
    %75 = arith.subf %67, %74 : vector<8x32xf32>
    %76 = arith.mulf %75, %75 : vector<8x32xf32>
    %cst_38 = arith.constant dense<0.000000e+00> : vector<8xf32>
    %77 = vector.multi_reduction <add>, %76, %cst_38 [1] : vector<8x32xf32> to vector<8xf32>
    %78 = vector.shape_cast %77 : vector<8xf32> to vector<8x1xf32>
    %cst_39 = arith.constant 3.200000e+01 : f32
    %79 = vector.broadcast %cst_39 : f32 to vector<8x1xf32>
    %80 = arith.divf %78, %79 : vector<8x1xf32>
    %cst_40 = arith.constant 9.99999974E-6 : f32
    %81 = vector.broadcast %cst_40 : f32 to vector<8x1xf32>
    %82 = arith.addf %80, %81 : vector<8x1xf32>
    %83 = math.rsqrt %82 : vector<8x1xf32>
    %84 = vector.broadcast %83 : vector<8x1xf32> to vector<8x32xf32>
    %85 = arith.mulf %75, %84 : vector<8x32xf32>
    %86 = vector.broadcast %68 : vector<1x32xf32> to vector<8x32xf32>
    %87 = arith.mulf %85, %86 : vector<8x32xf32>
    %88 = vector.broadcast %69 : vector<1x32xf32> to vector<8x32xf32>
    %89 = arith.addf %87, %88 : vector<8x32xf32>
    %90 = arith.truncf %89 : vector<8x32xf32> to vector<8x32xbf16>
    %c0_41 = arith.constant 0 : index
    %c0_42 = arith.constant 0 : index
    %91 = vector.load %arg11[%c0_41, %c0_42] : memref<32x128xbf16, #tpu.memory_space<vmem>>, vector<32x128xbf16>
    %cst_43 = arith.constant dense<0.000000e+00> : vector<8x128xf32>
    %92 = tpu.matmul %90, %91, %cst_43 {dimension_numbers = #tpu.dot_dimension_numbers<[1], [0], [0], [1], [0, 0, 1, 1], [], []>} : vector<8x32xbf16>, vector<32x128xbf16>, vector<8x128xf32> -> vector<8x128xf32>
    %c0_44 = arith.constant 0 : index
    %c0_45 = arith.constant 0 : index
    %93 = vector.load %arg12[%c0_44, %c0_45] : memref<1x128xf32, #tpu.memory_space<vmem>>, vector<1x128xf32>
    %94 = vector.broadcast %93 : vector<1x128xf32> to vector<8x128xf32>
    %95 = arith.addf %92, %94 : vector<8x128xf32>
    %cst_46 = arith.constant 5.000000e-01 : f32
    %96 = vector.broadcast %cst_46 : f32 to vector<8x128xf32>
    %97 = arith.mulf %96, %95 : vector<8x128xf32>
    %cst_47 = arith.constant 0.707106769 : f32
    %98 = vector.broadcast %cst_47 : f32 to vector<8x128xf32>
    %99 = arith.mulf %95, %98 : vector<8x128xf32>
    %cst_48 = arith.constant 0.000000e+00 : f32
    %100 = vector.broadcast %cst_48 : f32 to vector<8x128xf32>
    %101 = arith.cmpf oge, %99, %100 : vector<8x128xf32>
    %cst_49 = arith.constant 1.000000e+00 : f32
    %cst_50 = arith.constant -1.000000e+00 : f32
    %102 = vector.broadcast %cst_49 : f32 to vector<8x128xf32>
    %103 = vector.broadcast %cst_50 : f32 to vector<8x128xf32>
    %104 = arith.select %101, %102, %103 : vector<8x128xi1>, vector<8x128xf32>
    %105 = math.absf %99 : vector<8x128xf32>
    %cst_51 = arith.constant 0.327591091 : f32
    %106 = vector.broadcast %cst_51 : f32 to vector<8x128xf32>
    %107 = arith.mulf %106, %105 : vector<8x128xf32>
    %cst_52 = arith.constant 1.000000e+00 : f32
    %108 = vector.broadcast %cst_52 : f32 to vector<8x128xf32>
    %109 = arith.addf %108, %107 : vector<8x128xf32>
    %cst_53 = arith.constant 1.000000e+00 : f32
    %110 = vector.broadcast %cst_53 : f32 to vector<8x128xf32>
    %111 = arith.divf %110, %109 : vector<8x128xf32>
    %cst_54 = arith.constant 1.06140542 : f32
    %112 = vector.broadcast %cst_54 : f32 to vector<8x128xf32>
    %113 = arith.mulf %112, %111 : vector<8x128xf32>
    %cst_55 = arith.constant -1.45315206 : f32
    %114 = vector.broadcast %cst_55 : f32 to vector<8x128xf32>
    %115 = arith.addf %113, %114 : vector<8x128xf32>
    %116 = arith.mulf %115, %111 : vector<8x128xf32>
    %cst_56 = arith.constant 1.42141378 : f32
    %117 = vector.broadcast %cst_56 : f32 to vector<8x128xf32>
    %118 = arith.addf %116, %117 : vector<8x128xf32>
    %119 = arith.mulf %118, %111 : vector<8x128xf32>
    %cst_57 = arith.constant -0.284496725 : f32
    %120 = vector.broadcast %cst_57 : f32 to vector<8x128xf32>
    %121 = arith.addf %119, %120 : vector<8x128xf32>
    %122 = arith.mulf %121, %111 : vector<8x128xf32>
    %cst_58 = arith.constant 0.254829586 : f32
    %123 = vector.broadcast %cst_58 : f32 to vector<8x128xf32>
    %124 = arith.addf %122, %123 : vector<8x128xf32>
    %125 = arith.mulf %124, %111 : vector<8x128xf32>
    %cst_59 = arith.constant 0.000000e+00 : f32
    %126 = vector.broadcast %cst_59 : f32 to vector<8x128xf32>
    %127 = arith.subf %126, %105 : vector<8x128xf32>
    %128 = arith.mulf %127, %105 : vector<8x128xf32>
    %129 = math.exp %128 : vector<8x128xf32>
    %130 = arith.mulf %125, %129 : vector<8x128xf32>
    %cst_60 = arith.constant 1.000000e+00 : f32
    %131 = vector.broadcast %cst_60 : f32 to vector<8x128xf32>
    %132 = arith.subf %131, %130 : vector<8x128xf32>
    %133 = arith.mulf %104, %132 : vector<8x128xf32>
    %cst_61 = arith.constant 1.000000e+00 : f32
    %134 = vector.broadcast %cst_61 : f32 to vector<8x128xf32>
    %135 = arith.addf %134, %133 : vector<8x128xf32>
    %136 = arith.mulf %97, %135 : vector<8x128xf32>
    %137 = arith.truncf %136 : vector<8x128xf32> to vector<8x128xbf16>
    %c0_62 = arith.constant 0 : index
    %c0_63 = arith.constant 0 : index
    %138 = vector.load %arg13[%c0_62, %c0_63] : memref<128x32xbf16, #tpu.memory_space<vmem>>, vector<128x32xbf16>
    %cst_64 = arith.constant dense<0.000000e+00> : vector<8x32xf32>
    %139 = tpu.matmul %137, %138, %cst_64 {dimension_numbers = #tpu.dot_dimension_numbers<[1], [0], [0], [1], [0, 0, 1, 1], [], []>} : vector<8x128xbf16>, vector<128x32xbf16>, vector<8x32xf32> -> vector<8x32xf32>
    %c0_65 = arith.constant 0 : index
    %c0_66 = arith.constant 0 : index
    %140 = vector.load %arg14[%c0_65, %c0_66] : memref<1x32xf32, #tpu.memory_space<vmem>>, vector<1x32xf32>
    %141 = vector.broadcast %140 : vector<1x32xf32> to vector<8x32xf32>
    %142 = arith.addf %139, %141 : vector<8x32xf32>
    %143 = arith.addf %67, %142 : vector<8x32xf32>
    %c0_67 = arith.constant 0 : index
    %c0_68 = arith.constant 0 : index
    %c0_69 = arith.constant 0 : index
    %144 = vector.load %arg15[%c0_67, %c0_68, %c0_69] : memref<1x8x32xf32, #tpu.memory_space<vmem>>, vector<1x8x32xf32>
    %145 = vector.shape_cast %144 : vector<1x8x32xf32> to vector<8x32xf32>
    %146 = vector.shape_cast %143 : vector<8x32xf32> to vector<1x8x32xf32>
    tpu.vector_store %arg15[%c0_67, %c0_68, %c0_69], %146 {strides = array<i32>} : memref<1x8x32xf32, #tpu.memory_space<vmem>>, vector<1x8x32xf32>,
    return
  }
  func.func @transform_0(%arg0: i32) -> (i32, i32, i32) {
    %c0_i32 = arith.constant 0 : i32
    %c0_i32_0 = arith.constant 0 : i32
    %c0_i32_1 = arith.constant 0 : i32
    return %arg0, %c0_i32, %c0_i32_0 : i32, i32, i32
  }
  func.func @transform_1(%arg0: i32) -> (i32, i32) {
    %c0_i32 = arith.constant 0 : i32
    %c0_i32_0 = arith.constant 0 : i32
    %c0_i32_1 = arith.constant 0 : i32
    return %c0_i32, %c0_i32_0 : i32, i32
  }
  func.func @transform_2(%arg0: i32) -> (i32, i32) {
    %c0_i32 = arith.constant 0 : i32
    %c0_i32_0 = arith.constant 0 : i32
    %c0_i32_1 = arith.constant 0 : i32
    return %c0_i32, %c0_i32_0 : i32, i32
  }
  func.func @transform_3(%arg0: i32) -> (i32, i32, i32) {
    %c0_i32 = arith.constant 0 : i32
    %c0_i32_0 = arith.constant 0 : i32
    %c0_i32_1 = arith.constant 0 : i32
    %c0_i32_2 = arith.constant 0 : i32
    return %c0_i32, %c0_i32_0, %c0_i32_1 : i32, i32, i32
  }
  func.func @transform_4(%arg0: i32) -> (i32, i32, i32) {
    %c0_i32 = arith.constant 0 : i32
    %c0_i32_0 = arith.constant 0 : i32
    %c0_i32_1 = arith.constant 0 : i32
    %c0_i32_2 = arith.constant 0 : i32
    return %c0_i32, %c0_i32_0, %c0_i32_1 : i32, i32, i32
  }
  func.func @transform_5(%arg0: i32) -> (i32, i32, i32) {
    %c0_i32 = arith.constant 0 : i32
    %c0_i32_0 = arith.constant 0 : i32
    %c0_i32_1 = arith.constant 0 : i32
    %c0_i32_2 = arith.constant 0 : i32
    return %c0_i32, %c0_i32_0, %c0_i32_1 : i32, i32, i32
  }
  func.func @transform_6(%arg0: i32) -> (i32, i32, i32) {
    %c0_i32 = arith.constant 0 : i32
    %c0_i32_0 = arith.constant 0 : i32
    %c0_i32_1 = arith.constant 0 : i32
    %c0_i32_2 = arith.constant 0 : i32
    return %c0_i32, %c0_i32_0, %c0_i32_1 : i32, i32, i32
  }
  func.func @transform_7(%arg0: i32) -> (i32, i32) {
    %c0_i32 = arith.constant 0 : i32
    %c0_i32_0 = arith.constant 0 : i32
    %c0_i32_1 = arith.constant 0 : i32
    return %c0_i32, %c0_i32_0 : i32, i32
  }
  func.func @transform_8(%arg0: i32) -> (i32, i32) {
    %c0_i32 = arith.constant 0 : i32
    %c0_i32_0 = arith.constant 0 : i32
    %c0_i32_1 = arith.constant 0 : i32
    return %c0_i32, %c0_i32_0 : i32, i32
  }
  func.func @transform_9(%arg0: i32) -> (i32, i32) {
    %c0_i32 = arith.constant 0 : i32
    %c0_i32_0 = arith.constant 0 : i32
    %c0_i32_1 = arith.constant 0 : i32
    return %c0_i32, %c0_i32_0 : i32, i32
  }
  func.func @transform_10(%arg0: i32) -> (i32, i32) {
    %c0_i32 = arith.constant 0 : i32
    %c0_i32_0 = arith.constant 0 : i32
    %c0_i32_1 = arith.constant 0 : i32
    return %c0_i32, %c0_i32_0 : i32, i32
  }
  func.func @transform_11(%arg0: i32) -> (i32, i32) {
    %c0_i32 = arith.constant 0 : i32
    %c0_i32_0 = arith.constant 0 : i32
    %c0_i32_1 = arith.constant 0 : i32
    return %c0_i32, %c0_i32_0 : i32, i32
  }
  func.func @transform_12(%arg0: i32) -> (i32, i32) {
    %c0_i32 = arith.constant 0 : i32
    %c0_i32_0 = arith.constant 0 : i32
    %c0_i32_1 = arith.constant 0 : i32
    return %c0_i32, %c0_i32_0 : i32, i32
  }
  func.func @transform_13(%arg0: i32) -> (i32, i32) {
    %c0_i32 = arith.constant 0 : i32
    %c0_i32_0 = arith.constant 0 : i32
    %c0_i32_1 = arith.constant 0 : i32
    return %c0_i32, %c0_i32_0 : i32, i32
  }
  func.func @transform_14(%arg0: i32) -> (i32, i32, i32) {
    %c0_i32 = arith.constant 0 : i32
    %c0_i32_0 = arith.constant 0 : i32
    %c0_i32_1 = arith.constant 0 : i32
    return %arg0, %c0_i32, %c0_i32_0 : i32, i32, i32
  }
}

</mosaic_0001>

<bundles_post_ra>
// kernel: tpu_custom_call.1
= control target key start
LH: loop header
LB: loop body
LE: loop exit
PB: predicated region body
PF: predicated region fallthrough
CT: control target
= control target key end

     0   :  { %s3122_s0 = inlined_call_operand.vmem [shape: f32[2,8,32], index: 0, kind: input, shape index: {}]   ;;  %s3123_s1 = inlined_call_operand.vmem [shape: f32[1,32], index: 1, kind: input, shape index: {}]   ;;  %s3124_s2 = inlined_call_operand.vmem [shape: f32[1,32], index: 2, kind: input, shape index: {}]   ;;  %s3125_s3 = inlined_call_operand.vmem [shape: bf16[4,32,8], index: 3, kind: input, shape index: {}]   ;;  %s3126_s4 = inlined_call_operand.vmem [shape: bf16[4,32,8], index: 4, kind: input, shape index: {}]   ;;  %s3127_s5 = inlined_call_operand.vmem [shape: bf16[4,32,8], index: 5, kind: input, shape index: {}]   ;;  %s3128_s6 = inlined_call_operand.vmem [shape: bf16[4,8,32], index: 6, kind: input, shape index: {}]   ;;  %s3129_s7 = inlined_call_operand.vmem [shape: f32[1,32], index: 7, kind: input, shape index: {}]   ;;  %s3130_s8 = inlined_call_operand.vmem [shape: f32[1,32], index: 8, kind: input, shape index: {}]   ;;  %s3131_s9 = inlined_call_operand.vmem [shape: f32[1,32], index: 9, kind: input, shape index: {}]   ;;  %s3132_s10 = inlined_call_operand.vmem [shape: bf16[32,128], index: 10, kind: input, shape index: {}]   ;;  %s3133_s11 = inlined_call_operand.vmem [shape: f32[1,128], index: 11, kind: input, shape index: {}]   ;;  %s3134_s12 = inlined_call_operand.vmem [shape: bf16[128,32], index: 12, kind: input, shape index: {}]   ;;  %s3135_s13 = inlined_call_operand.vmem [shape: f32[1,32], index: 13, kind: input, shape index: {}]   ;;  %s3136_s14 = inlined_call_operand.hbm [shape: f32[2,8,32], index: 14, kind: output, shape index: {}]  }
   0x1   :  { %3137 = sst [smem:[#allocation5_spill]] %s3122_s0 }
   0x2   :  { %3138 = sst [smem:[#allocation6_spill]] %s3123_s1 }
   0x3   :  { %3139 = sst [smem:[#allocation7_spill]] %s3124_s2 }
   0x4   :  { %3140 = sst [smem:[#allocation8_spill]] %s3125_s3 }
   0x5   :  { %19 = vsyncpa [#allocation3], 0 }
   0x6   :  { %21 = vsyncpa [#allocation3 + $0x1], 0  ;;  %s2703_s29 = smov 0   ;;  %s2705_s30 = smov 0  }
   0x7   :  { %s2707_s15 = smov 0   ;;  %s2709_s16 = smov 0  }
   0x8 LB: > { %s2724_s17 = sadd.s32 4294967295, %s2622_s16   ;;  %s2116_s18 = sadd.s32 4294967294, %s2622_s16   ;;  %s2622_s16 = sphi %s2709_s16, %s3150_s16   ;;  %s2618_s15 = sphi %s2707_s15, %s3149_s15   ;;  %s2614_s30 = sphi %s2705_s30, %s3148_s30   ;;  %s2610_s29 = sphi %s2703_s29, %s3147_s29  }
   0x9   : > { %s2728_s19 = sadd.s32 1, %s2622_s16   ;;  %s333_s20 = sadd.s32 1, %s2618_s15 }
   0xa   : > { %s330_s21 = ssub.s32 %s2622_s16, %s2728_s19  ;;  %p343_p0 = scmp.ne.s32.totalorder %s2618_s15, %s2614_s30 }
   0xb   : > { %p331_p1 = scmp.eq.s32.totalorder %s330_s21, 0  ;;  %p344_p2 = scmp.eq.s32.totalorder %s2724_s17, 1 }
   0xc   : > { %p349_p3 = scmp.ne.s32.totalorder %s2614_s30, %s2610_s29  ;;  %p350_p4 = scmp.eq.s32.totalorder %s2116_s18, 1 }
   0xd   : > { %s2739_s22 = scalar_select %p331_p1, %s2618_s15, %s333_s20  }
   0xe   : > { %p2741_p5 = por %p344_p2, %p343_p0  ;;  %p2745_p6 = por %p350_p4, %p349_p3 }
   0xf   : > { %p2119_p7 = scmp.ge.s32.totalorder %s2622_s16, 1  ;;  %p414_p8 = scmp.lt.s32.totalorder %s2622_s16, 3 }
  0x11   : > { %p415_p9 = pnand %p2119_p7, %p414_p8 }
  0x12   : > { %p459_p10 = scmp.lt.s32.totalorder (!%p415_p9), %s2724_s17, 1  ;;  %vm467_vm0 = vcmask (!%p415_p9), 261120   ;;  %s3143_s0 = sld [smem:[#allocation5_spill]] (!%p415_p9)  ;;  %v2624_v9 = vmov (!%p415_p9), 0.0   ;;  %vm2625_vm1 = vmmov (!%p415_p9), 0   ;;  %v2507_v22 = vld [vmem:[%s3126_s4 + $0x10] sm:$0xff] (!%p415_p9)  }
  0x13   : > { %418 = sbr.rel (%p415_p9) target bundleno = 2372 (0x944), region = 76  ;;  %s3144_s3 = sld [smem:[#allocation8_spill]] (!%p415_p9)  ;;  %2264 = vmatprep.subr.bf16.mxu0 (!%p415_p9), %v2624_v9  ;;  %2288 = vmatprep.subr.bf16.mxu1 (!%p415_p9), %v2624_v9  ;;  %v2509_v25 = vld [vmem:[%s3126_s4 + $0x18] sm:$0xff] (!%p415_p9)   ;;  %v2511_v27 = vld [vmem:[%s3126_s4 + $0x30] sm:$0xff] (!%p415_p9)   ;;  %v2514_v30 = vld [vmem:[%s3126_s4] sm:$0xff] (!%p415_p9)   ;;  %vm1180_vm2 = vcmask (!%p415_p9), 64512  }
  0x14   : > { %2268 = vmatprep.mubr.msk.bf16.mxu0 (!%p415_p9), %vm2625_vm1, %v2624_v9  ;;  %2292 = vmatprep.mubr.msk.bf16.mxu1 (!%p415_p9), %vm2625_vm1, %v2624_v9  ;;  %s3145_s1 = sld [smem:[#allocation6_spill]] (!%p415_p9)  ;;  %s3146_s2 = sld [smem:[#allocation7_spill]] (!%p415_p9)  ;;  %v2513_v29 = vld [vmem:[%s3126_s4 + $0x38] sm:$0xff] (!%p415_p9)   ;;  %v2515_v31 = vld [vmem:[%s3127_s5 + $0x10] sm:$0xff] (!%p415_p9)   ;;  %v2516_v32 = vld [vmem:[%s3126_s4 + $0x8] sm:$0xff] (!%p415_p9)   ;;  %vm1420_vm3 = vcmask (!%p415_p9), 1043456  }
  0x15   : > { %v2517_v33 = vld [vmem:[%s3127_s5 + $0x18] sm:$0xff] (!%p415_p9)   ;;  %v2518_v34 = vld [vmem:[%s3126_s4 + $0x20] sm:$0xff] (!%p415_p9)   ;;  %v2519_v35 = vld [vmem:[%s3127_s5 + $0x30] sm:$0xff] (!%p415_p9)   ;;  %s456_s21 = sand.u32 (!%p415_p9), 1, %s2614_s30  }
  0x16   : > { %v2520_v36 = vld [vmem:[%s3126_s4 + $0x28] sm:$0xff] (!%p415_p9)   ;;  %v2521_v37 = vld [vmem:[%s3127_s5 + $0x38] sm:$0xff] (!%p415_p9)   ;;  %v2522_v38 = vld [vmem:[%s3127_s5] sm:$0xff] (!%p415_p9)  }
  0x17   : > { %v2523_v39 = vld [vmem:[%s3127_s5 + $0x8] sm:$0xff] (!%p415_p9)   ;;  %v2524_v40 = vld [vmem:[%s3127_s5 + $0x20] sm:$0xff] (!%p415_p9)  }
  0x18   : > { %v2525_v41 = vld [vmem:[%s3127_s5 + $0x28] sm:$0xff] (!%p415_p9)  }
  0x19   : > { %v2502_v7 = vld [vmem:[%s3144_s3] sm:$0xff] (!%p415_p9)   ;;  %v2503_v8 = vld [vmem:[%s3144_s3 + $0x30] sm:$0xff] (!%p415_p9)   ;;  %v2504_v10 = vld [vmem:[%s3144_s3 + $0x8] sm:$0xff] (!%p415_p9)  }
  0x1a   : > { %s460_s25 = scalar_select %p459_p10, %s2724_s17, 1  ;;  %2265 = vmatpush3.bf16.msra.mxu0 %v2502_v7  ;;  %2289 = vmatpush3.bf16.msra.mxu1 %v2503_v8  ;;  %v2505_v11 = vld [vmem:[%s3144_s3 + $0x38] sm:$0xff]   ;;  %v2122_v16 = vld [vmem:[%s3145_s1] ss:$0 sm:$0xff]  ;;  %v2506_v21 = vld [vmem:[%s3144_s3 + $0x10] sm:$0xff]  }
  0x1b   : > { %2266 = vmatprep.subr.bf16.mxu0 %v2624_v9  ;;  %2290 = vmatprep.subr.bf16.mxu1 %v2624_v9  ;;  %v2123_v18 = vld [vmem:[%s3146_s2] ss:$0 sm:$0xff]  ;;  %v2508_v24 = vld [vmem:[%s3144_s3 + $0x18] sm:$0xff]   ;;  %v2512_v28 = vld [vmem:[%s3144_s3 + $0x28] sm:$0xff]  }
  0x1c   : > { %s2121_s26 = sshll.u32 %s460_s25, 3  ;;  %v2510_v26 = vld [vmem:[%s3144_s3 + $0x20] sm:$0xff]   ;;  %s2120_s25 = sshll.u32 %s456_s21, 3 }
  0x1d   : > { %s462_s18 = scalar_lea.vmem %s3143_s0, %s2121_s26  ;;  %s2189_s0 = sshll.u32 %s2724_s17, 7 }
  0x1e   : > { %v2756_v0 = vld [vmem:[%s462_s18] sm:$0xff]  ;;  %2267 = vmatpush3.bf16.msra.mxu0 %v2504_v10  ;;  %2291 = vmatpush3.bf16.msra.mxu1 %v2505_v11  ;;  %s458_s28 = scalar_lea.vmem [#allocation2], %s2120_s25  ;;  %s3079_s2 = scalar_lea.hbm %s3136_s14, %s2189_s0 }
  0x1f   : > { %v468_v1 = vsel %vm467_vm0, %v2756_v0, 0.0  ;;  %2272 = vmatprep.subr.bf16.mxu0 %v2624_v9  ;;  %2304 = vmatprep.subr.bf16.mxu1 %v2624_v9  ;;  %s2057_s18 = sshll.u32 %s458_s28, 4  ;;  %s2044_s17 = scalar_lea.sflag [#allocation3], %s456_s21  ;;  %s3081_s18 = int_to_ptr.vmem [resolvable:$true] %s2057_s18 }
  0x20   : > { %469 = vadd.xlane.f32.xlu0 %v468_v1  ;;  %s2560_s25 = scalar_lea.vmem %s3081_s18, 128  ;;  %s2627_s26 = smov [#allocation2]  }
  0x21   : > { %p2561_p11 = scmp.ne.s32.totalorder %s3081_s18, %s2560_s25  ;;  %s2564_s27 = sshll.u32 %s2627_s26, 4  ;;  %s2565_s27 = int_to_ptr.vmem [resolvable:$false] %s2564_s27 }
  0x22   : > { %s2566_s3 = scalar_lea.vmem %s2565_s27, 256  ;;  %p2567_p0 = scmp.lt.s32.totalorder %s3081_s18, %s2565_s27 }
  0x23   : > { %p2562_p12 = pnand %p2561_p11, %p2741_p5  ;;  %p2568_p1 = scmp.lt.s32.totalorder %s2566_s3, %s2560_s25 }
  0x25   : > { %p2563_p13 = pneg %p2562_p12  ;;  %p2569_p2 = por %p2568_p1, %p2567_p0 }
  0x27   : > { %p2570_p3 = pnand %p2569_p2, %p2563_p13 }
  0xad   : > { %v470_v2 = vpop.xlane.xlu0 %469 }
  0xae   : > { %v472_v3 = vmul.f32 0.03125, %v470_v2 }
  0xb0   : > { %v473_v4 = vsub.f32 %v2756_v0, %v472_v3 }
  0xb2   : > { %v474_v5 = vmul.f32 %v473_v4, %v473_v4 }
  0xb4   : > { %v475_v6 = vsel %vm467_vm0, %v474_v5, 0.0 }
  0xb5   : > { %476 = vadd.xlane.f32.xlu0 %v475_v6 }
 0x142   : > { %v477_v12 = vpop.xlane.xlu0 %476 }
 0x143   : > { %v478_v13 = vmul.f32 0.03125, %v477_v12 }
 0x145   : > { %v479_v14 = vadd.f32 1e-05, %v478_v13 }
 0x147   : > { %2536 = vrsqrt.f32 %v479_v14 }
 0x151   : > { %v2537_v15 = vpop.eup %2536 }
 0x152   : > { %v481_v17 = vmul.f32 %v2537_v15, %v473_v4 }
 0x154   : > { %v488_v19 = vmul.f32 %v2122_v16, %v481_v17 }
 0x156   : > { %v495_v20 = vadd.f32 %v2123_v18, %v488_v19 }
 0x158   : > { %v2796_v23 = vpack.c.bf16 %v495_v20, %v495_v20 }
 0x15a   : > { %2269 = vmatmul.mubr.msk.bf16.vlgmr.msra.gmra.mrb[0].mxu0 %vm467_vm0, %v2796_v23  ;;  %2293 = vmatmul.mubr.msk.bf16.vlgmr.msra.gmra.mrb[0].mxu1 %vm467_vm0, %v2796_v23 }
 0x15b   : > { %2273 = vmatpush3.bf16.msra.mxu0 %v2506_v21  ;;  %2305 = vmatpush3.bf16.msra.mxu1 %v2507_v22 }
 0x15c   : > { %2274 = vmatprep.subr.bf16.mxu0 %v2624_v9  ;;  %2306 = vmatprep.subr.bf16.mxu1 %v2624_v9 }
 0x15d   : > { %2276 = vmatprep.mubr.msk.bf16.mxu0 %vm2625_vm1, %v2624_v9  ;;  %2308 = vmatprep.mubr.msk.bf16.mxu1 %vm2625_vm1, %v2624_v9 }
 0x15f   : > { %2275 = vmatpush3.bf16.msra.mxu0 %v2508_v24  ;;  %2307 = vmatpush3.bf16.msra.mxu1 %v2509_v25 }
 0x160   : > { %2280 = vmatprep.subr.bf16.mxu0 %v2624_v9  ;;  %2320 = vmatprep.subr.bf16.mxu1 %v2624_v9 }
 0x162   : > { %2277 = vmatmul.mubr.msk.bf16.vlgmr.msra.gmra.mrb[4].mxu0 %vm467_vm0, %v2796_v23  ;;  %2309 = vmatmul.mubr.msk.bf16.vlgmr.msra.gmra.mrb[4].mxu1 %vm467_vm0, %v2796_v23 }
 0x163   : > { %2281 = vmatpush3.bf16.msra.mxu0 %v2510_v26  ;;  %2321 = vmatpush3.bf16.msra.mxu1 %v2511_v27 }
 0x164   : > { %2282 = vmatprep.subr.bf16.mxu0 %v2624_v9  ;;  %2322 = vmatprep.subr.bf16.mxu1 %v2624_v9 }
 0x165   : > { %2284 = vmatprep.mubr.msk.bf16.mxu0 %vm2625_vm1, %v2624_v9  ;;  %2324 = vmatprep.mubr.msk.bf16.mxu1 %vm2625_vm1, %v2624_v9 }
 0x167   : > { %2283 = vmatpush3.bf16.msra.mxu0 %v2512_v28  ;;  %2323 = vmatpush3.bf16.msra.mxu1 %v2513_v29 }
 0x168   : > { %2296 = vmatprep.subr.bf16.mxu0 %v2624_v9  ;;  %2336 = vmatprep.subr.bf16.mxu1 %v2624_v9 }
 0x16a   : > { %2285 = vmatmul.mubr.msk.bf16.vlgmr.msra.gmra.mrb[8].mxu0 %vm467_vm0, %v2796_v23  ;;  %2325 = vmatmul.mubr.msk.bf16.vlgmr.msra.gmra.mrb[8].mxu1 %vm467_vm0, %v2796_v23 }
 0x16b   : > { %2297 = vmatpush3.bf16.msra.mxu0 %v2514_v30  ;;  %2337 = vmatpush3.bf16.msra.mxu1 %v2515_v31 }
 0x16c   : > { %2298 = vmatprep.subr.bf16.mxu0 %v2624_v9  ;;  %2338 = vmatprep.subr.bf16.mxu1 %v2624_v9 }
 0x16d   : > { %2300 = vmatprep.mubr.msk.bf16.mxu0 %vm2625_vm1, %v2624_v9  ;;  %2340 = vmatprep.mubr.msk.bf16.mxu1 %vm2625_vm1, %v2624_v9 }
 0x16f   : > { %2299 = vmatpush3.bf16.msra.mxu0 %v2516_v32  ;;  %2339 = vmatpush3.bf16.msra.mxu1 %v2517_v33 }
 0x170   : > { %2312 = vmatprep.subr.bf16.mxu0 %v2624_v9  ;;  %2352 = vmatprep.subr.bf16.mxu1 %v2624_v9 }
 0x172   : > { %2301 = vmatmul.mubr.msk.bf16.vlgmr.msra.gmra.mrb[12].mxu0 %vm467_vm0, %v2796_v23  ;;  %2341 = vmatmul.mubr.msk.bf16.vlgmr.msra.gmra.mrb[12].mxu1 %vm467_vm0, %v2796_v23 }
 0x173   : > { %2313 = vmatpush3.bf16.msra.mxu0 %v2518_v34  ;;  %2353 = vmatpush3.bf16.msra.mxu1 %v2519_v35 }
 0x174   : > { %2314 = vmatprep.subr.bf16.mxu0 %v2624_v9  ;;  %2354 = vmatprep.subr.bf16.mxu1 %v2624_v9 }
 0x175   : > { %2316 = vmatprep.mubr.msk.bf16.mxu0 %vm2625_vm1, %v2624_v9  ;;  %2356 = vmatprep.mubr.msk.bf16.mxu1 %vm2625_vm1, %v2624_v9 }
 0x177   : > { %2315 = vmatpush3.bf16.msra.mxu0 %v2520_v36  ;;  %2355 = vmatpush3.bf16.msra.mxu1 %v2521_v37 }
 0x178   : > { %2328 = vmatprep.subr.bf16.mxu0 %v2624_v9  ;;  %2366 = vmatprep.subr.bf16.mxu1 %v2624_v9 }
 0x17a   : > { %2317 = vmatmul.mubr.msk.bf16.vlgmr.msra.gmra.mrb[16].mxu0 %vm467_vm0, %v2796_v23  ;;  %2357 = vmatmul.mubr.msk.bf16.vlgmr.msra.gmra.mrb[16].mxu1 %vm467_vm0, %v2796_v23 }
 0x17b   : > { %2329 = vmatpush3.bf16.msra.mxu0 %v2522_v38  ;;  %2332 = vmatprep.mubr.msk.bf16.mxu0 %vm2625_vm1, %v2624_v9 }
 0x17c   : > { %2330 = vmatprep.subr.bf16.mxu0 %v2624_v9  ;;  %2368 = vmatprep.mubr.msk.bf16.mxu1 %vm2625_vm1, %v2624_v9 }
 0x17f   : > { %2331 = vmatpush3.bf16.msra.mxu0 %v2523_v39 }
 0x180   : > { %2344 = vmatprep.subr.bf16.mxu0 %v2624_v9 }
 0x182   : > { %2333 = vmatmul.mubr.msk.bf16.vlgmr.msra.gmra.mrb[20].mxu0 %vm467_vm0, %v2796_v23 }
 0x183   : > { %2345 = vmatpush3.bf16.msra.mxu0 %v2524_v40  ;;  %2348 = vmatprep.mubr.msk.bf16.mxu0 %vm2625_vm1, %v2624_v9 }
 0x184   : > { %2346 = vmatprep.subr.bf16.mxu0 %v2624_v9 }
 0x187   : > { %2347 = vmatpush3.bf16.msra.mxu0 %v2525_v41 }
 0x188   : > { %2360 = vmatprep.subr.bf16.mxu0 %v2624_v9 }
 0x18a   : > { %2349 = vmatmul.mubr.msk.bf16.vlgmr.msra.gmra.mrb[24].mxu0 %vm467_vm0, %v2796_v23 }
 0x18b   : > { %2362 = vmatprep.mubr.msk.bf16.mxu0 %vm2625_vm1, %v2624_v9 }
 0x22d   : > { %v2920_v42 = vpop.f32.mrb[0].mxu0  ;;  %v718_v43 = vpop.f32.mrb[0].mxu1 }
 0x22e   : > { %v2270_v44 = vpop.f32.mrb[1].mxu0  ;;  %v2294_v45 = vpop.f32.mrb[1].mxu1  ;;  %v1175_v11 = vpack.c.bf16 %v718_v43, %v718_v43  ;;  %v1172_v24 = vpack.c.bf16 %v2920_v42, %v2920_v42 }
 0x22f   : > { %v565_v46 = vpop.f32.mrb[2].mxu0  ;;  %v721_v47 = vpop.f32.mrb[2].mxu1 }
 0x230   : > { %v2271_v48 = vpop.f32.mrb[3].mxu0  ;;  %v2295_v49 = vpop.f32.mrb[3].mxu1 }
 0x235   : > { %v614_v50 = vpop.f32.mrb[4].mxu0  ;;  %v838_v51 = vpop.f32.mrb[4].mxu1 }
 0x236   : > { %v1177_v52 = vpack.c.bf16 %v838_v51, %v838_v51  ;;  %v2278_v53 = vpop.f32.mrb[5].mxu0  ;;  %v2310_v54 = vpop.f32.mrb[5].mxu1  ;;  %v1173_v62 = vpack.c.bf16 %v614_v50, %v614_v50 }
 0x237   : > { %v617_v55 = vpop.f32.mrb[6].mxu0  ;;  %v841_v56 = vpop.f32.mrb[6].mxu1 }
 0x238   : > { %v1231_v57 = vsel %vm1180_vm2, %v1177_v52, 0  ;;  %v2279_v58 = vpop.f32.mrb[7].mxu0  ;;  %v2311_v59 = vpop.f32.mrb[7].mxu1 }
 0x239   : > { %2367 = vmatpush3.bf16.xpose.msra.mxu1 %v1231_v57 }
 0x23a   : > { %2378 = vmatprep.subr.bf16.mxu1 %v2624_v9 }
 0x23d   : > { %v666_v60 = vpop.f32.mrb[8].mxu0  ;;  %v942_v61 = vpop.f32.mrb[8].mxu1 }
 0x23e   : > { %v1179_v63 = vpack.c.bf16 %v942_v61, %v942_v61  ;;  %v2286_v1 = vpop.f32.mrb[9].mxu0  ;;  %v2326_v2 = vpop.f32.mrb[9].mxu1  ;;  %v1174_v34 = vpack.c.bf16 %v666_v60, %v666_v60 }
 0x23f   : > { %v669_v3 = vpop.f32.mrb[10].mxu0  ;;  %v945_v4 = vpop.f32.mrb[10].mxu1 }
 0x240   : > { %v1323_v5 = vsel %vm1180_vm2, %v1179_v63, 0  ;;  %v2287_v6 = vpop.f32.mrb[11].mxu0  ;;  %v2327_v7 = vpop.f32.mrb[11].mxu1  ;;  %2369 = vmatmul.mubr.msk.bf16.vlgmr.msra.gmra.mrb[20].mxu1 %vm1180_vm2, %v1173_v62 }
 0x241   : > { %2379 = vmatpush3.bf16.xpose.msra.mxu1 %v1323_v5  ;;  %2380 = vmatprep.mubr.msk.bf16.mxu1 %vm2625_vm1, %v2624_v9 }
 0x242   : > { %2390 = vmatprep.subr.bf16.mxu1 %v2624_v9 }
 0x245   : > { %v786_v8 = vpop.f32.mrb[12].mxu0  ;;  %v1062_v10 = vpop.f32.mrb[12].mxu1 }
 0x246   : > { %v1176_v12 = vpack.c.bf16 %v786_v8, %v786_v8  ;;  %v1414_v13 = vpack.c.bf16 %v1062_v10, %v1062_v10  ;;  %v2302_v14 = vpop.f32.mrb[13].mxu0  ;;  %v2342_v15 = vpop.f32.mrb[13].mxu1 }
 0x247   : > { %v789_v16 = vpop.f32.mrb[14].mxu0  ;;  %v1065_v17 = vpop.f32.mrb[14].mxu1 }
 0x248   : > { %v1185_v18 = vsel %vm1180_vm2, %v1176_v12, 0  ;;  %v1468_v19 = vsel %vm1420_vm3, %v1414_v13, 0  ;;  %v2303_v20 = vpop.f32.mrb[15].mxu0  ;;  %v2343_v21 = vpop.f32.mrb[15].mxu1  ;;  %2381 = vmatmul.mubr.msk.bf16.vlgmr.msra.gmra.mrb[24].mxu1 %vm1180_vm2, %v1175_v11 }
 0x249   : > { %2361 = vmatpush3.bf16.xpose.msra.mxu0 %v1185_v18  ;;  %2391 = vmatpush3.bf16.msra.mxu1 %v1468_v19 }
 0x24a   : > { %2372 = vmatprep.subr.bf16.mxu0 %v2624_v9  ;;  %2392 = vmatprep.mubr.msk.bf16.mxu1 %vm2625_vm1, %v2624_v9 }
 0x24b   : > { %2402 = vmatprep.subr.bf16.mxu1 %v2624_v9 }
 0x24d   : > { %v890_v22 = vpop.f32.mrb[16].mxu0  ;;  %v2936_v23 = vpop.f32.mrb[16].mxu1 }
 0x24e   : > { %v1178_v25 = vpack.c.bf16 %v890_v22, %v890_v22  ;;  %v2318_v26 = vpop.f32.mrb[17].mxu0  ;;  %v2358_v27 = vpop.f32.mrb[17].mxu1 }
 0x24f   : > { %v893_v28 = vpop.f32.mrb[18].mxu0  ;;  %v1169_v29 = vpop.f32.mrb[18].mxu1 }
 0x250   : > { %v1277_v30 = vsel %vm1180_vm2, %v1178_v25, 0  ;;  %v2319_v31 = vpop.f32.mrb[19].mxu0  ;;  %v2359_v32 = vpop.f32.mrb[19].mxu1  ;;  %2363 = vmatmul.mubr.msk.bf16.vlgmr.msra.gmra.mrb[28].mxu0 %vm1180_vm2, %v1172_v24 }
 0x251   : > { %2373 = vmatpush3.bf16.xpose.msra.mxu0 %v1277_v30  ;;  %2374 = vmatprep.mubr.msk.bf16.mxu0 %vm2625_vm1, %v2624_v9  ;;  %v1416_v32 = vpack.c.bf16 %v2936_v23, %v2936_v23  ;;  %v1606_v23 = vld [vmem:[%s3128_s6] sm:$0xf] }
 0x252   : > { %2384 = vmatprep.subr.bf16.mxu0 %v2624_v9 }
 0x255   : > { %v1010_v33 = vpop.f32.mrb[20].mxu0 }
 0x256   : > { %v1413_v35 = vpack.c.bf16 %v1010_v33, %v1010_v33  ;;  %v2334_v36 = vpop.f32.mrb[21].mxu0 }
 0x257   : > { %v1013_v37 = vpop.f32.mrb[22].mxu0 }
 0x258   : > { %v1422_v38 = vsel %vm1420_vm3, %v1413_v35, 0  ;;  %v2335_v39 = vpop.f32.mrb[23].mxu0  ;;  %2375 = vmatmul.mubr.msk.bf16.vlgmr.msra.gmra.mrb[32].mxu0 %vm1180_vm2, %v1174_v34 }
 0x259   : > { %2385 = vmatpush3.bf16.msra.mxu0 %v1422_v38  ;;  %2386 = vmatprep.mubr.msk.bf16.mxu0 %vm2625_vm1, %v2624_v9  ;;  %v1560_v38 = vsel %vm1420_vm3, %v1416_v32, 0 }
 0x25a   : > { %2396 = vmatprep.subr.bf16.mxu0 %v2624_v9 }
 0x25d   : > { %v2950_v40 = vpop.f32.mrb[24].mxu0 }
 0x25e   : > { %v2350_v41 = vpop.f32.mrb[25].mxu0  ;;  %v1415_v28 = vpack.c.bf16 %v2950_v40, %v2950_v40 }
 0x25f   : > { %v1117_v42 = vpop.f32.mrb[26].mxu0 }
 0x260   : > { %v2351_v43 = vpop.f32.mrb[27].mxu0  ;;  %v1514_v33 = vsel %vm1420_vm3, %v1415_v28, 0  ;;  %v1614_v42 = vsel %vm1420_vm3, %v1606_v23, 0 }
 0x313   : > { %v1267_v44 = vpop.f32.mrb[20].mxu1 }
 0x314   : > { %v2370_v45 = vpop.f32.mrb[21].mxu1  ;;  %v1368_v57 = vsel %vm1180_vm2, %v1267_v44, -inf }
 0x315   : > { %v1270_v46 = vpop.f32.mrb[22].mxu1 }
 0x316   : > { %v2371_v47 = vpop.f32.mrb[23].mxu1  ;;  %v1608_v46 = vld [vmem:[%s3128_s6 + $0x8] sm:$0xf] }
 0x31b   : > { %v1359_v48 = vpop.f32.mrb[24].mxu1 }
 0x31c   : > { %v2382_v49 = vpop.f32.mrb[25].mxu1  ;;  %v1374_v60 = vsel %vm1180_vm2, %v1359_v48, -inf }
 0x31d   : > { %v1362_v50 = vpop.f32.mrb[26].mxu1 }
 0x31e   : > { %v2383_v51 = vpop.f32.mrb[27].mxu1  ;;  %v1706_v50 = vsel %vm1420_vm3, %v1608_v46, 0 }
 0x323   : > { %v1221_v52 = vpop.f32.mrb[28].mxu0 }
 0x324   : > { %v2364_v53 = vpop.f32.mrb[29].mxu0  ;;  %v1365_v54 = vsel %vm1180_vm2, %v1221_v52, -inf }
 0x325   : > { %1366 = vmax.xlane.f32.xlu1 %v1365_v54  ;;  %v1224_v55 = vpop.f32.mrb[30].mxu0 }
 0x326   : > { %v2365_v56 = vpop.f32.mrb[31].mxu0 }
 0x329   : > { %1369 = vmax.xlane.f32.xlu1 %v1368_v57 }
 0x32b   : > { %v1313_v58 = vpop.f32.mrb[32].mxu0 }
 0x32c   : > { %v2376_v59 = vpop.f32.mrb[33].mxu0  ;;  %v1371_v61 = vsel %vm1180_vm2, %v1313_v58, -inf }
 0x32d   : > { %1375 = vmax.xlane.f32.xlu1 %v1374_v60  ;;  %1372 = vmax.xlane.f32.xlu0 %v1371_v61  ;;  %v1316_v62 = vpop.f32.mrb[34].mxu0 }
 0x32e   : > { %v2377_v63 = vpop.f32.mrb[35].mxu0 }
 0x3b2   : > { %v1367_v1 = vpop.xlane.xlu1 %1366 }
 0x3b3   : > { %v1377_v2 = vsub.f32 %v1221_v52, %v1367_v1  ;;  %v1609_v52 = vld [vmem:[%s3128_s6 + $0xc] sm:$0xf] }
 0x3b4   : > { %v1752_v57 = vsel %vm1420_vm3, %v1609_v52, 0  ;;  %v2533_v52 = vld [vmem:[%s3134_s12 + $0x28] sm:$0xff]  }
 0x3b5   : > { %v1381_v3 = vmul.f32 1.442695, %v1377_v2 }
 0x3b6   : > { %v1370_v4 = vpop.xlane.xlu1 %1369 }
 0x3b7   : > { %2538 = vpow2.f32 %v1381_v3  ;;  %v1378_v5 = vsub.f32 %v1267_v44, %v1370_v4  ;;  %v1607_v44 = vld [vmem:[%s3128_s6 + $0x4] sm:$0xf] }
 0x3b8   : > { %v1660_v45 = vsel %vm1420_vm3, %v1607_v44, 0 }
 0x3b9   : > { %v1383_v6 = vmul.f32 1.442695, %v1378_v5 }
 0x3ba   : > { %v1376_v7 = vpop.xlane.xlu1 %1375  ;;  %v1373_v8 = vpop.xlane.xlu0 %1372 }
 0x3bb   : > { %2540 = vpow2.f32 %v1383_v6  ;;  %v1380_v10 = vsub.f32 %v1359_v48, %v1376_v7  ;;  %v1379_v11 = vsub.f32 %v1313_v58, %v1373_v8 }
 0x3bd   : > { %v1387_v12 = vmul.f32 1.442695, %v1380_v10  ;;  %v1385_v13 = vmul.f32 1.442695, %v1379_v11 }
 0x3bf   : > { %2542 = vpow2.f32 %v1387_v12 }
 0x3c0   : > { %2544 = vpow2.f32 %v1385_v13 }
 0x3c1   : > { %v2539_v14 = vpop.eup %2538 }
 0x3c2   : > { %v1389_v15 = vsel %vm1180_vm2, %v2539_v14, 0.0 }
 0x3c3   : > { %1390 = vadd.xlane.f32.xlu0 %v1389_v15 }
 0x3c5   : > { %v2541_v16 = vpop.eup %2540 }
 0x3c6   : > { %v1392_v17 = vsel %vm1180_vm2, %v2541_v16, 0.0 }
 0x3c7   : > { %1393 = vadd.xlane.f32.xlu1 %v1392_v17 }
 0x3c9   : > { %v2543_v18 = vpop.eup %2542 }
 0x3ca   : > { %v2545_v19 = vpop.eup %2544  ;;  %v1398_v20 = vsel %vm1180_vm2, %v2543_v18, 0.0 }
 0x3cb   : > { %1399 = vadd.xlane.f32.xlu1 %v1398_v20  ;;  %v1395_v21 = vsel %vm1180_vm2, %v2545_v19, 0.0 }
 0x3cc   : > { %1396 = vadd.xlane.f32.xlu0 %v1395_v21 }
 0x450   : > { %v1391_v22 = vpop.xlane.xlu0 %1390 }
 0x451   : > { %2546 = vrcp.f32 %v1391_v22 }
 0x454   : > { %v1394_v24 = vpop.xlane.xlu1 %1393 }
 0x455   : > { %2548 = vrcp.f32 %v1394_v24  ;;  %v2172_v24 = vld [vmem:[%s3129_s7] ss:$0 sm:$0xff] }
 0x458   : > { %v1400_v25 = vpop.xlane.xlu1 %1399 }
 0x459   : > { %2550 = vrcp.f32 %v1400_v25  ;;  %v1397_v26 = vpop.xlane.xlu0 %1396 }
 0x45a   : > { %2552 = vrcp.f32 %v1397_v26 }
 0x45b   : > { %v2547_v27 = vpop.eup %2546 }
 0x45c   : > { %v1405_v29 = vmul.f32 %v2547_v27, %v2539_v14 }
 0x45e   : > { %v1409_v30 = vpack.c.bf16 %v1405_v29, %v1405_v29 }
 0x45f   : > { %v2549_v31 = vpop.eup %2548 }
 0x460   : > { %v1406_v34 = vmul.f32 %v2549_v31, %v2541_v16  ;;  %2387 = vmatmul.mubr.msk.bf16.vlgmr.msra.gmra.mrb[36].mxu0 %vm1180_vm2, %v1409_v30 }
 0x461   : > { %2397 = vmatpush3.bf16.msra.mxu0 %v1514_v33  ;;  %2398 = vmatprep.mubr.msk.bf16.mxu0 %vm2625_vm1, %v2624_v9 }
 0x462   : > { %v1410_v35 = vpack.c.bf16 %v1406_v34, %v1406_v34  ;;  %2408 = vmatprep.subr.bf16.mxu0 %v2624_v9 }
 0x463   : > { %v2551_v36 = vpop.eup %2550 }
 0x464   : > { %v2553_v37 = vpop.eup %2552  ;;  %2393 = vmatmul.mubr.msk.bf16.vlgmr.msra.gmra.mrb[28].mxu1 %vm1180_vm2, %v1410_v35  ;;  %v1408_v40 = vmul.f32 %v2551_v36, %v2543_v18 }
 0x465   : > { %v1407_v39 = vmul.f32 %v2553_v37, %v2545_v19  ;;  %2403 = vmatpush3.bf16.msra.mxu1 %v1560_v38  ;;  %2404 = vmatprep.mubr.msk.bf16.mxu1 %vm2625_vm1, %v2624_v9  ;;  %v2526_v37 = vld [vmem:[%s3132_s10] sm:$0xff]  }
 0x466   : > { %2414 = vmatprep.subr.bf16.mxu1 %v2624_v9  ;;  %v1412_v43 = vpack.c.bf16 %v1408_v40, %v1408_v40 }
 0x467   : > { %v1411_v41 = vpack.c.bf16 %v1407_v39, %v1407_v39 }
 0x469   : > { %2399 = vmatmul.mubr.msk.bf16.vlgmr.msra.gmra.mrb[40].mxu0 %vm1180_vm2, %v1411_v41  ;;  %v2173_v41 = vld [vmem:[%s3130_s8] ss:$0 sm:$0xff] }
 0x46a   : > { %2409 = vmatpush3.bf16.msra.mxu0 %v1614_v42  ;;  %2410 = vmatprep.mubr.msk.bf16.mxu0 %vm2625_vm1, %v2624_v9 }
 0x46b   : > { %2420 = vmatprep.subr.bf16.mxu0 %v2624_v9 }
 0x46c   : > { %2405 = vmatmul.mubr.msk.bf16.vlgmr.msra.gmra.mrb[32].mxu1 %vm1180_vm2, %v1412_v43  ;;  %v2174_v43 = vld [vmem:[%s3131_s9] ss:$0 sm:$0xff] }
 0x46d   : > { %2416 = vmatprep.mubr.msk.bf16.mxu1 %vm2625_vm1, %v2624_v9  ;;  %2415 = vmatpush3.bf16.msra.mxu1 %v1660_v45 }
 0x46e   : > { %2426 = vmatprep.subr.bf16.mxu1 %v2624_v9 }
 0x533   : > { %v1458_v47 = vpop.f32.mrb[36].mxu0 }
 0x534   : > { %v1602_v48 = vpack.c.bf16 %v1458_v47, %v1458_v47  ;;  %v2388_v49 = vpop.f32.mrb[37].mxu0  ;;  %v2528_v47 = vld [vmem:[%s3134_s12] sm:$0xff]  }
 0x535   : > { %v1461_v51 = vpop.f32.mrb[38].mxu0  ;;  %v2530_v49 = vld [vmem:[%s3134_s12 + $0x10] sm:$0xff]  }
 0x536   : > { %v2389_v53 = vpop.f32.mrb[39].mxu0  ;;  %2411 = vmatmul.mubr.msk.bf16.vlgmr.msra.gmra.mrb[44].mxu0 %vm1180_vm2, %v1602_v48  ;;  %v2529_v48 = vld [vmem:[%s3134_s12 + $0x8] sm:$0xff]   ;;  %v2532_v51 = vld [vmem:[%s3134_s12 + $0x20] sm:$0xff]  }
 0x537   : > { %v1504_v54 = vpop.f32.mrb[28].mxu1  ;;  %2421 = vmatpush3.bf16.msra.mxu0 %v1706_v50  ;;  %2422 = vmatprep.mubr.msk.bf16.mxu0 %vm2625_vm1, %v2624_v9  ;;  %v2531_v50 = vld [vmem:[%s3134_s12 + $0x18] sm:$0xff]   ;;  %v2534_v53 = vld [vmem:[%s3134_s12 + $0x30] sm:$0xff]  }
 0x538   : > { %v1603_v55 = vpack.c.bf16 %v1504_v54, %v1504_v54  ;;  %v2394_v56 = vpop.f32.mrb[29].mxu1  ;;  %2432 = vmatprep.subr.bf16.mxu0 %v2624_v9  ;;  %v2535_v54 = vld [vmem:[%s3134_s12 + $0x38] sm:$0xff]  }
 0x539   : > { %v1507_v58 = vpop.f32.mrb[30].mxu1 }
 0x53a   : > { %v2395_v59 = vpop.f32.mrb[31].mxu1  ;;  %2417 = vmatmul.mubr.msk.bf16.vlgmr.msra.gmra.mrb[36].mxu1 %vm1180_vm2, %v1603_v55  ;;  %v2175_v55 = vld [vmem:[%s3133_s11] ss:$0 sm:$0xff] }
 0x53b   : > { %2427 = vmatpush3.bf16.msra.mxu1 %v1752_v57  ;;  %2428 = vmatprep.mubr.msk.bf16.mxu1 %vm2625_vm1, %v2624_v9 }
 0x53c   : > { %v1550_v60 = vpop.f32.mrb[40].mxu0  ;;  %2440 = vmatprep.subr.bf16.mxu1 %v2624_v9 }
 0x53d   : > { %v1604_v61 = vpack.c.bf16 %v1550_v60, %v1550_v60  ;;  %v2400_v62 = vpop.f32.mrb[41].mxu0 }
 0x53e   : > { %v1553_v63 = vpop.f32.mrb[42].mxu0 }
 0x53f   : > { %v2401_v1 = vpop.f32.mrb[43].mxu0  ;;  %2423 = vmatmul.mubr.msk.bf16.vlgmr.msra.gmra.mrb[48].mxu0 %vm1180_vm2, %v1604_v61  ;;  %v1596_v2 = vpop.f32.mrb[32].mxu1 }
 0x540   : > { %v1605_v3 = vpack.c.bf16 %v1596_v2, %v1596_v2  ;;  %v2406_v4 = vpop.f32.mrb[33].mxu1  ;;  %2436 = vmatprep.mubr.msk.bf16.mxu0 %vm2625_vm1, %v2624_v9  ;;  %2433 = vmatpush3.bf16.msra.mxu0 %v2526_v37 }
 0x541   : > { %v1599_v5 = vpop.f32.mrb[34].mxu1  ;;  %2434 = vmatprep.subr.bf16.mxu0 %v2624_v9 }
 0x542   : > { %v2407_v6 = vpop.f32.mrb[35].mxu1  ;;  %2429 = vmatmul.mubr.msk.bf16.vlgmr.msra.gmra.mrb[40].mxu1 %vm1180_vm2, %v1605_v3 }
 0x543   : > { %2456 = vmatprep.mubr.msk.bf16.mxu1 %vm2625_vm1, %v2624_v9  ;;  %2441 = vmatpush3.bf16.msra.mxu1 %v2528_v47 }
 0x544   : > { %2442 = vmatprep.subr.bf16.mxu1 %v2624_v9 }
 0x547   : > { %2443 = vmatpush3.bf16.msra.mxu1 %v2529_v48 }
 0x548   : > { %2444 = vmatprep.subr.bf16.mxu1 %v2624_v9 }
 0x54b   : > { %2445 = vmatpush3.bf16.msra.mxu1 %v2530_v49 }
 0x54c   : > { %2446 = vmatprep.subr.bf16.mxu1 %v2624_v9 }
 0x54f   : > { %2447 = vmatpush3.bf16.msra.mxu1 %v2531_v50 }
 0x550   : > { %2448 = vmatprep.subr.bf16.mxu1 %v2624_v9 }
 0x553   : > { %2449 = vmatpush3.bf16.msra.mxu1 %v2532_v51 }
 0x554   : > { %2450 = vmatprep.subr.bf16.mxu1 %v2624_v9 }
 0x557   : > { %2451 = vmatpush3.bf16.msra.mxu1 %v2533_v52 }
 0x558   : > { %2452 = vmatprep.subr.bf16.mxu1 %v2624_v9 }
 0x55b   : > { %2453 = vmatpush3.bf16.msra.mxu1 %v2534_v53 }
 0x55c   : > { %2454 = vmatprep.subr.bf16.mxu1 %v2624_v9 }
 0x55f   : > { %2455 = vmatpush3.bf16.msra.mxu1 %v2535_v54 }
 0x609   : > { %v1650_v7 = vpop.f32.mrb[44].mxu0 }
 0x60a   : > { %v2412_v8 = vpop.f32.mrb[45].mxu0 }
 0x60b   : > { %v1653_v10 = vpop.f32.mrb[46].mxu0 }
 0x60c   : > { %v2413_v11 = vpop.f32.mrb[47].mxu0 }
 0x60d   : > { %v1696_v12 = vpop.f32.mrb[36].mxu1 }
 0x60e   : > { %v1794_v13 = vadd.f32 %v1696_v12, %v1650_v7  ;;  %v2418_v14 = vpop.f32.mrb[37].mxu1 }
 0x60f   : > { %v1699_v15 = vpop.f32.mrb[38].mxu1 }
 0x610   : > { %v2419_v16 = vpop.f32.mrb[39].mxu1 }
 0x612   : > { %v1742_v17 = vpop.f32.mrb[48].mxu0 }
 0x613   : > { %v1795_v18 = vadd.f32 %v1794_v13, %v1742_v17  ;;  %v2424_v19 = vpop.f32.mrb[49].mxu0 }
 0x614   : > { %v1745_v20 = vpop.f32.mrb[50].mxu0 }
 0x615   : > { %v2425_v21 = vpop.f32.mrb[51].mxu0  ;;  %v1788_v22 = vpop.f32.mrb[40].mxu1 }
 0x616   : > { %v1796_v25 = vadd.f32 %v1795_v18, %v1788_v22  ;;  %v2430_v26 = vpop.f32.mrb[41].mxu1  ;;  %v2626_v18 = vmov -1.0  }
 0x617   : > { %v1791_v27 = vpop.f32.mrb[42].mxu1  ;;  %v2179_v26 = vld [vmem:[%s3135_s13] ss:$0 sm:$0xff] }
 0x618   : > { %v1804_v28 = vadd.f32 %v2172_v24, %v1796_v25  ;;  %v2431_v29 = vpop.f32.mrb[43].mxu1 }
 0x61a   : > { %v3016_v30 = vadd.f32 %v1804_v28, %v2756_v0  ;;  %v2527_v0 = vld [vmem:[%s3132_s10 + $0x8] sm:$0xff]  }
 0x61b   : > { %2435 = vmatpush3.bf16.msra.mxu0 %v2527_v0 }
 0x61c   : > { %v1808_v31 = vsel %vm467_vm0, %v3016_v30, 0.0 }
 0x61d   : > { %1809 = vadd.xlane.f32.xlu0 %v1808_v31 }
 0x6aa   : > { %v1810_v32 = vpop.xlane.xlu0 %1809 }
 0x6ab   : > { %v1811_v33 = vmul.f32 0.03125, %v1810_v32 }
 0x6ad   : > { %v1812_v34 = vsub.f32 %v3016_v30, %v1811_v33 }
 0x6af   : > { %v1813_v35 = vmul.f32 %v1812_v34, %v1812_v34 }
 0x6b1   : > { %v1814_v36 = vsel %vm467_vm0, %v1813_v35, 0.0 }
 0x6b2   : > { %1815 = vadd.xlane.f32.xlu1 %v1814_v36 }
 0x73f   : > { %v1816_v38 = vpop.xlane.xlu1 %1815 }
 0x740   : > { %v1817_v23 = vmul.f32 0.03125, %v1816_v38 }
 0x742   : > { %v1818_v39 = vadd.f32 1e-05, %v1817_v23 }
 0x744   : > { %2554 = vrsqrt.f32 %v1818_v39 }
 0x74e   : > { %v2555_v40 = vpop.eup %2554 }
 0x74f   : > { %v1820_v42 = vmul.f32 %v2555_v40, %v1812_v34 }
 0x751   : > { %v1827_v44 = vmul.f32 %v2173_v41, %v1820_v42 }
 0x753   : > { %v1834_v45 = vadd.f32 %v2174_v43, %v1827_v44 }
 0x755   : > { %v1835_v46 = vpack.c.bf16 %v1834_v45, %v1834_v45 }
 0x757   : > { %2437 = vmatmul.mubr.msk.bf16.vlgmr.msra.gmra.mrb[52].mxu0 %vm467_vm0, %v1835_v46 }
 0x82a   : > { %v1896_v56 = vpop.f32.mrb[52].mxu0 }
 0x82b   : > { %v1897_v57 = vadd.f32 %v2175_v55, %v1896_v56  ;;  %v2438_v58 = vpop.f32.mrb[53].mxu0 }
 0x82c   : > { %v1899_v59 = vpop.f32.mrb[54].mxu0 }
 0x82d   : > { %v1903_v60 = vmul.f32 0.70710677, %v1897_v57  ;;  %v2439_v61 = vpop.f32.mrb[55].mxu0  ;;  %v1902_v21 = vmul.f32 0.5, %v1897_v57 }
 0x82f   : > { %v1906_v62 = vand.u32 2147483647, %v1903_v60  ;;  %vm1904_vm4 = vcmp.ge.f32.partialorder %v1903_v60, 0.0 }
 0x830   : > { %v1905_v19 = vsel %vm1904_vm4, 1.0, %v2626_v18 }
 0x831   : > { %v1907_v63 = vmul.f32 0.3275911, %v1906_v62  ;;  %v1920_v9 = vsub.f32 0.0, %v1906_v62 }
 0x833   : > { %v1908_v1 = vadd.f32 1.0, %v1907_v63  ;;  %v1921_v3 = vmul.f32 %v1920_v9, %v1906_v62 }
 0x835   : > { %2556 = vrcp.f32 %v1908_v1  ;;  %v1922_v6 = vmul.f32 1.442695, %v1921_v3 }
 0x837   : > { %2558 = vpow2.f32 %v1922_v6 }
 0x83f   : > { %v2557_v2 = vpop.eup %2556 }
 0x840   : > { %v1911_v4 = vmul.f32 1.0614054, %v2557_v2 }
 0x841   : > { %v2559_v15 = vpop.eup %2558 }
 0x842   : > { %v1912_v5 = vadd.f32 -1.4531521, %v1911_v4 }
 0x844   : > { %v1913_v7 = vmul.f32 %v2557_v2, %v1912_v5 }
 0x846   : > { %v1914_v8 = vadd.f32 1.4214138, %v1913_v7 }
 0x848   : > { %v1915_v10 = vmul.f32 %v2557_v2, %v1914_v8 }
 0x84a   : > { %v1916_v11 = vadd.f32 -0.28449672, %v1915_v10 }
 0x84c   : > { %v1917_v12 = vmul.f32 %v2557_v2, %v1916_v11 }
 0x84e   : > { %v1918_v13 = vadd.f32 0.2548296, %v1917_v12 }
 0x850   : > { %v1919_v14 = vmul.f32 %v2557_v2, %v1918_v13 }
 0x852   : > { %v1924_v16 = vmul.f32 %v2559_v15, %v1919_v14 }
 0x854   : > { %v1925_v17 = vsub.f32 1.0, %v1924_v16 }
 0x856   : > { %v1926_v20 = vmul.f32 %v1925_v17, %v1905_v19 }
 0x858   : > { %v1927_v22 = vadd.f32 1.0, %v1926_v20 }
 0x85a   : > { %v1928_v24 = vmul.f32 %v1927_v22, %v1902_v21 }
 0x85c   : > { %v1929_v25 = vpack.c.bf16 %v1928_v24, %v1928_v24 }
 0x85e   : > { %2457 = vmatmul.mubr.bf16.vlgmr.msra.gmra.mrb[44].mxu1 %v1929_v25 }
 0x931   : > { %v2035_v27 = vpop.f32.mrb[44].mxu1 }
 0x932   : > { %v2036_v28 = vadd.f32 %v2179_v26, %v2035_v27  ;;  %v2458_v29 = vpop.f32.mrb[45].mxu1 }
 0x933   : > { %v2038_v31 = vpop.f32.mrb[46].mxu1 }
 0x934   : > { %v2041_v32 = vadd.f32 %v2036_v28, %v3016_v30  ;;  %v2459_v33 = vpop.f32.mrb[47].mxu1 }
 0x936   : > { %2042 = vst.msk [vmem:[%s458_s28] sm:$0xff] %vm467_vm0, %v2041_v32 }
 0x937   : > { %2573 = shalt.err (!%p2570_p3)
}
 0x938   : > { %s2574_s1 = scalar_lea.hbm %s3079_s2, 128  ;;  %s2578_s28 = scalar_lea.hbm %s3136_s14, 256 }
 0x939   : > { %p2575_p4 = scmp.ne.s32.totalorder %s3079_s2, %s2574_s1  ;;  %p2579_p9 = scmp.lt.u32.totalorder %s3079_s2, %s3136_s14 }
 0x93a   : > { %p2580_p10 = scmp.lt.u32.totalorder %s2578_s28, %s2574_s1  ;;  %p2582_p12 = scmp.lt.u32.totalorder %s2574_s1, %s3079_s2 }
 0x93b   : > { %p2576_p7 = pnand %p2575_p4, %p2741_p5 }
 0x93c   : > { %p2581_p11 = por %p2580_p10, %p2579_p9 }
 0x93d   : > { %p2577_p8 = pneg %p2576_p7 }
 0x93e   : > { %p2583_p13 = por %p2582_p12, %p2581_p11 }
 0x940   : > { %p2584_p0 = pnand %p2583_p13, %p2577_p8 }
 0x942   : > { %2587 = shalt.err (!%p2584_p0)
}
 0x943   : > { %2460 = dma.vmem_to_hbm [thread:$0]  (%p2741_p5), %s3081_s18, 128, %s3079_s2, %s2044_s17  }
 0x944 PF: > { %p2466_p1 = scmp.ge.s32.totalorder %s2622_s16, 2  ;;  %s2069_s3 = sand.u32 1, %s2610_s29  }
 0x945   : > { %s2070_s25 = scalar_lea.sflag [#allocation3], %s2069_s3 }
 0x946   : > { %p2463_p2 = pnand %p2466_p1, %p2745_p6 }
 0x948   : > { %2605 = dma.done.wait (!%p2463_p2), %s2070_s25, 128  }
 0x949   : > { %2607 = vsyncadd (!%p2463_p2), %s2070_s25, 4294967168  ;;  %p24_p3 = scmp.ge.s32.totalorder %s2728_s19, 4   ;;  %s3147_s29 = smov %s2614_s30 }
 0x94a   : > { %s3148_s30 = smov %s2618_s15  ;;  %s3149_s15 = smov %s2739_s22 }
 0x94b   : > { %s3150_s16 = smov %s2728_s19  ;;  %26 = sbr.rel (!%p24_p3) target bundleno = 8 (0x8), region = 111 }
 0x952   :  { %2075 = vsyncpa [#allocation3], 1 }
 0x953   :  { %2077 = vsyncpa [#allocation3 + $0x1], 1 }

</bundles_post_ra>
